<compile_context>
chip_gen: v7x
topology: tpu7x:2x2x1
jax: 0.10.0
libtpu: 0.0.40
codegen_flags: <defaults>
</compile_context>

<pallas_src>
import jax
import jax.numpy as jnp
from jax import lax
from jax.experimental import pallas as pl
from jax.experimental.pallas import tpu as pltpu

EPS = 1e-5
LANE = 128


def _round_up(x, m):
    return ((x + m - 1) // m) * m


def _pick_tile_h(h, w, target_rows):
    """Largest divisor of H whose tile_h * W row count stays <= target_rows."""
    best = 1
    for cand in range(1, h + 1):
        if h % cand == 0 and cand * w <= target_rows:
            best = cand
    return best


def _vmem_limit_bytes():
    """Generation-aware VMEM limit with headroom below physical capacity."""
    cap = None
    get_info = getattr(pltpu, "get_tpu_info", None)
    if get_info is not None:
        try:
            info = get_info()
            for name in ("vmem_capacity_bytes", "vmem_bytes", "vmem_size_bytes"):
                val = getattr(info, name, None)
                if isinstance(val, int) and val > 0:
                    cap = val
                    break
        except Exception:
            cap = None
    if cap is None:
        cap = 64 * 1024 * 1024  # conservative fallback: v7x physical VMEM
    # -> ~48 MiB on v7x (64 MiB physical), ~112 MiB on v5e/v6e (128 MiB).
    return int(max(32 * 1024 * 1024,
                   min(cap - 16 * 1024 * 1024, 112 * 1024 * 1024)))


def _cost(flops, bytes_accessed):
    return pl.CostEstimate(flops=int(flops), transcendentals=0,
                           bytes_accessed=int(bytes_accessed))


def _compiler_params(n_axes, vmem_limit):
    return pltpu.CompilerParams(
        dimension_semantics=("parallel",) * n_axes,
        vmem_limit_bytes=int(vmem_limit),
    )


# ------------------------------ kernels -------------------------------------

def _write_stats(sum_ref, sq_ref, y_f32):
    """Per-tile partial BN statistics (reduced across tiles in the wrapper)."""
    sum_ref[...] = jnp.sum(y_f32, axis=0).reshape(sum_ref.shape)
    sq_ref[...] = jnp.sum(y_f32 * y_f32, axis=0).reshape(sq_ref.shape)


def _conv1x1_stats_kernel(x_ref, w_ref, y_ref, sum_ref, sq_ref):
    """y = x @ w (1x1 conv over a (1, TH, W, C) row tile) + partial stats."""
    _, th, w, cin = x_ref.shape
    x = x_ref[...].reshape(th * w, cin)
    y = jnp.dot(x, w_ref[...], preferred_element_type=jnp.float32)
    y_ref[...] = y.reshape(y_ref.shape).astype(y_ref.dtype)
    _write_stats(sum_ref, sq_ref, y)


def _bn_relu_conv1x1_stats_kernel(y_in_ref, scale_ref, shift_ref, w_ref,
                                  y_ref, sum_ref, sq_ref):
    """y = relu(y_in*scale + shift) @ w  (BN fused into the consumer) + stats."""
    _, th, w, c = y_in_ref.shape
    h = y_in_ref[...].reshape(th * w, c)
    h = jnp.maximum(h * scale_ref[0] + shift_ref[0], 0.0)
    y = jnp.dot(h, w_ref[...], preferred_element_type=jnp.float32)
    y_ref[...] = y.reshape(y_ref.shape).astype(y_ref.dtype)
    _write_stats(sum_ref, sq_ref, y)


def _bn_relu_conv3x3_stats_kernel(y1_ref, top_ref, bot_ref, scale_ref, shift_ref,
                                  w2_ref, y2_ref, sum_ref, sq_ref, pad_ref):
    """BN1+ReLU fused, then stride-1/pad-1 3x3 conv as 9 shifted-window matmuls.

    The zero-padded (th+2, w+2, C) activation tile is built once in VMEM
    scratch (halo rows come from 1-row blocked specs on unpadded y1, zeroed at
    the image boundary).  Each kernel tap is then a plain static slice of the
    padded tile followed by an MXU matmul accumulated in f32 registers — no
    rolls, no iota masks, no full-tile selects.
    """
    _, th, w, c = y1_ref.shape
    co = w2_ref.shape[-1]
    dt = w2_ref.dtype
    j = pl.program_id(1)
    nj = pl.num_programs(1)

    scale = scale_ref[0]
    shift = shift_ref[0]

    def bn_relu(v):
        return jnp.maximum(v * scale + shift, 0.0).astype(dt)

    # Border columns rewritten to zero every step (cheap; safe no matter how the
    # parallel grid is split across TensorCores, since scratch is per-core).
    zero_col = jnp.zeros((th + 2, 1, c), dt)
    pad_ref[:, 0:1, :] = zero_col
    pad_ref[:, w + 1:w + 2, :] = zero_col
    pad_ref[1:th + 1, 1:w + 1, :] = bn_relu(y1_ref[0])

    zero_row = jnp.zeros((1, w, c), dt)

    @pl.when(j == 0)
    def _():
        pad_ref[0:1, 1:w + 1, :] = zero_row

    @pl.when(j > 0)
    def _():
        pad_ref[0:1, 1:w + 1, :] = bn_relu(top_ref[0])

    @pl.when(j == nj - 1)
    def _():
        pad_ref[th + 1:th + 2, 1:w + 1, :] = zero_row

    @pl.when(j < nj - 1)
    def _():
        pad_ref[th + 1:th + 2, 1:w + 1, :] = bn_relu(bot_ref[0])

    # Nine back-to-back matmul-accumulates (f32 accumulator kept in registers /
    # MXU result path; Mosaic may fuse the accumulation on v7x's MRB).
    acc = jnp.zeros((th * w, co), jnp.float32)
    for ky in range(3):
        for kx in range(3):
            lhs = pad_ref[ky:ky + th, kx:kx + w, :].reshape(th * w, c)
            acc = acc + jnp.dot(lhs, w2_ref[ky * 3 + kx],
                                preferred_element_type=jnp.float32)

    y2_ref[...] = acc.reshape(y2_ref.shape).astype(y2_ref.dtype)
    _write_stats(sum_ref, sq_ref, acc)


def _bn_add_relu_kernel(y_ref, res_ref, scale_ref, shift_ref, o_ref):
    """out = relu(y*scale + shift + residual)."""
    out = jnp.maximum(y_ref[...] * scale_ref[0] + shift_ref[0] + res_ref[...], 0.0)
    o_ref[...] = out.astype(o_ref.dtype)


# ------------------------------ wrapper --------------------------------------

def _bn_scale_shift(sum_tiles, sq_tiles, count, gamma_p, beta_p, dtype):
    """Fold per-tile partial sums into training-mode BN scale/shift vectors."""
    s = jnp.sum(sum_tiles, axis=(0, 1, 2))
    ss = jnp.sum(sq_tiles, axis=(0, 1, 2))
    mean = s / count
    # E[x^2]-E[x]^2 in f32 can cancel for very large N*H*W; clamp keeps it sane.
    var = jnp.maximum(ss / count - mean * mean, 0.0)   # biased batch variance
    scale = gamma_p * lax.rsqrt(var + EPS)
    shift = beta_p - mean * scale
    return scale.reshape(1, -1).astype(dtype), shift.reshape(1, -1).astype(dtype)


def bottleneck_forward_nhwc(x_nhwc, params, *, compute_dtype=jnp.bfloat16,
                            tile_h=None, out_dtype=None):
    """Bottleneck forward (stride=1, downsample=None), NHWC in / NHWC out."""
    n, h, w, cin = x_nhwc.shape
    planes = params["w1"].shape[0]
    cout = 4 * planes
    assert cin == cout, "stride=1 / downsample=None requires inplanes == 4*planes"
    # TODO(synk): stride>1 and the optional downsample branch are not implemented.
    out_dtype = x_nhwc.dtype if out_dtype is None else out_dtype

    cin_p = _round_up(cin, LANE)
    pp = _round_up(planes, LANE)
    cout_p = _round_up(cout, LANE)
    assert cin_p == cout_p

    f32 = jnp.float32
    act_bytes = jnp.dtype(compute_dtype).itemsize
    out_bytes = jnp.dtype(out_dtype).itemsize
    # Large row tiles amortize the ~0.35us per-grid-step overhead; scale the
    # budget down for wide channel counts so pass-2 scratch stays small.
    target_rows = max(256, (8192 * LANE) // max(pp, 1))
    th = tile_h if tile_h is not None else _pick_tile_h(h, w, target_rows)
    assert h % th == 0
    ht = h // th
    m = n * h * w
    count = float(m)
    vmem_limit = _vmem_limit_bytes()

    # ---- fold conv weights to matmul matrices, pad channels to 128 lanes ----
    x_p = jnp.pad(x_nhwc, ((0, 0), (0, 0), (0, 0),
                           (0, cin_p - cin))).astype(compute_dtype)
    w1m = jnp.pad(params["w1"][:, :, 0, 0].T,
                  ((0, cin_p - cin), (0, pp - planes))).astype(compute_dtype)
    w2m = jnp.transpose(params["w2"], (2, 3, 1, 0)).reshape(9, planes, planes)
    w2m = jnp.pad(w2m, ((0, 0), (0, pp - planes),
                        (0, pp - planes))).astype(compute_dtype)
    w3m = jnp.pad(params["w3"][:, :, 0, 0].T,
                  ((0, pp - planes), (0, cout_p - cout))).astype(compute_dtype)
    g1 = jnp.pad(params["g1"], (0, pp - planes)).astype(f32)
    b1 = jnp.pad(params["b1"], (0, pp - planes)).astype(f32)
    g2 = jnp.pad(params["g2"], (0, pp - planes)).astype(f32)
    b2 = jnp.pad(params["b2"], (0, pp - planes)).astype(f32)
    g3 = jnp.pad(params["g3"], (0, cout_p - cout)).astype(f32)
    b3 = jnp.pad(params["b3"], (0, cout_p - cout)).astype(f32)

    row_spec = lambda c: pl.BlockSpec((1, th, w, c), lambda i, j: (i, j, 0, 0))
    stat_spec = lambda c: pl.BlockSpec((1, 1, 1, c), lambda i, j: (i, j, 0, 0))
    vec_spec = lambda c: pl.BlockSpec((1, c), lambda i, j: (0, 0))
    wmat_spec = lambda ci, co: pl.BlockSpec((ci, co), lambda i, j: (0, 0))
    # One-row halo blocks read from unpadded y1 (block height 1 -> block index
    # along H is the element row); clamped at the boundary, zeroed in-kernel.
    halo_top = pl.BlockSpec((1, 1, w, pp),
                            lambda i, j: (i, jnp.maximum(j * th - 1, 0), 0, 0))
    halo_bot = pl.BlockSpec((1, 1, w, pp),
                            lambda i, j: (i, jnp.minimum(j * th + th, h - 1), 0, 0))

    # ---- pass 1: 1x1 conv (x @ W1) + partial BN1 stats ----------------------
    y1, s1, q1 = pl.pallas_call(
        _conv1x1_stats_kernel,
        grid=(n, ht),
        in_specs=[row_spec(cin_p), wmat_spec(cin_p, pp)],
        out_specs=(row_spec(pp), stat_spec(pp), stat_spec(pp)),
        out_shape=(jax.ShapeDtypeStruct((n, h, w, pp), compute_dtype),
                   jax.ShapeDtypeStruct((n, ht, 1, pp), f32),
                   jax.ShapeDtypeStruct((n, ht, 1, pp), f32)),
        compiler_params=_compiler_params(2, vmem_limit),
        cost_estimate=_cost(2 * m * cin_p * pp,
                            m * (cin_p + pp) * act_bytes
                            + cin_p * pp * act_bytes),
    )(x_p, w1m)
    scale1, shift1 = _bn_scale_shift(s1, q1, count, g1, b1, compute_dtype)

    # ---- pass 2: fused BN1+ReLU -> 3x3 conv (halo row tiles) + BN2 stats ----
    y2, s2, q2 = pl.pallas_call(
        _bn_relu_conv3x3_stats_kernel,
        grid=(n, ht),
        in_specs=[row_spec(pp), halo_top, halo_bot,
                  vec_spec(pp), vec_spec(pp),
                  pl.BlockSpec((9, pp, pp), lambda i, j: (0, 0, 0))],
        out_specs=(row_spec(pp), stat_spec(pp), stat_spec(pp)),
        out_shape=(jax.ShapeDtypeStruct((n, h, w, pp), compute_dtype),
                   jax.ShapeDtypeStruct((n, ht, 1, pp), f32),
                   jax.ShapeDtypeStruct((n, ht, 1, pp), f32)),
        scratch_shapes=[pltpu.VMEM((th + 2, w + 2, pp), compute_dtype)],
        compiler_params=_compiler_params(2, vmem_limit),
        cost_estimate=_cost(2 * 9 * m * pp * pp,
                            2 * m * pp * act_bytes + 9 * pp * pp * act_bytes),
    )(y1, y1, y1, scale1, shift1, w2m)
    scale2, shift2 = _bn_scale_shift(s2, q2, count, g2, b2, compute_dtype)

    # ---- pass 3: fused BN2+ReLU -> 1x1 conv (h2 @ W3) + partial BN3 stats ---
    y3, s3, q3 = pl.pallas_call(
        _bn_relu_conv1x1_stats_kernel,
        grid=(n, ht),
        in_specs=[row_spec(pp), vec_spec(pp), vec_spec(pp),
                  wmat_spec(pp, cout_p)],
        out_specs=(row_spec(cout_p), stat_spec(cout_p), stat_spec(cout_p)),
        out_shape=(jax.ShapeDtypeStruct((n, h, w, cout_p), compute_dtype),
                   jax.ShapeDtypeStruct((n, ht, 1, cout_p), f32),
                   jax.ShapeDtypeStruct((n, ht, 1, cout_p), f32)),
        compiler_params=_compiler_params(2, vmem_limit),
        cost_estimate=_cost(2 * m * pp * cout_p,
                            m * (pp + cout_p) * act_bytes
                            + pp * cout_p * act_bytes),
    )(y2, scale2, shift2, w3m)
    scale3, shift3 = _bn_scale_shift(s3, q3, count, g3, b3, compute_dtype)

    # ---- pass 4: BN3 + residual add + ReLU ----------------------------------
    out_p = pl.pallas_call(
        _bn_add_relu_kernel,
        grid=(n, ht),
        in_specs=[row_spec(cout_p), row_spec(cin_p),
                  vec_spec(cout_p), vec_spec(cout_p)],
        out_specs=row_spec(cout_p),
        out_shape=jax.ShapeDtypeStruct((n, h, w, cout_p), out_dtype),
        compiler_params=_compiler_params(2, vmem_limit),
        cost_estimate=_cost(4 * m * cout_p,
                            m * cout_p * (2 * act_bytes + out_bytes)),
    )(y3, x_p, scale3, shift3)

    if cout_p != cout:   # real ResNet stages have cout % 128 == 0 -> no slice
        out_p = out_p[..., :cout]
    return out_p


def bottleneck_forward(x_nchw, params, **kwargs):
    """NCHW wrapper matching the PyTorch module's layout.

    Call bottleneck_forward_nhwc directly if the surrounding model is already
    channels-last (saves the two full-tensor layout transposes at the edges).
    """
    x_nhwc = jnp.transpose(x_nchw, (0, 2, 3, 1))
    out = bottleneck_forward_nhwc(x_nhwc, params, **kwargs)
    return jnp.transpose(out, (0, 3, 1, 2))


# ---------------- Pure-JAX reference (correctness check) ---------------------

def _ref_forward(x, p):
    def conv(x, w, pad=0):
        return jax.lax.conv_general_dilated(
            x, w, (1, 1), [(pad, pad), (pad, pad)],
            dimension_numbers=("NCHW", "OIHW", "NCHW"))

    def bn(x, g, b):
        mean = jnp.mean(x, axis=(0, 2, 3), keepdims=True)
        var = jnp.mean((x - mean) ** 2, axis=(0, 2, 3), keepdims=True)
        return ((x - mean) * jax.lax.rsqrt(var + EPS)
                * g.reshape(1, -1, 1, 1) + b.reshape(1, -1, 1, 1))

    out = jax.nn.relu(bn(conv(x, p["w1"]), p["g1"], p["b1"]))
    out = jax.nn.relu(bn(conv(out, p["w2"], pad=1), p["g2"], p["b2"]))
    out = bn(conv(out, p["w3"]), p["g3"], p["b3"])
    return jax.nn.relu(out + x)


if __name__ == "__main__":
    N, H, W = 2, 16, 16
    planes = 4
    inplanes = planes * 4  # downsample=None -> residual shapes must match

    key = jax.random.PRNGKey(0)
    ks = jax.random.split(key, 10)
    x = jax.random.normal(ks[0], (N, inplanes, H, W), jnp.float32)

    params = {
        "w1": 0.1 * jax.random.normal(ks[1], (planes, inplanes, 1, 1), jnp.float32),
        "w2": 0.1 * jax.random.normal(ks[2], (planes, planes, 3, 3), jnp.float32),
        "w3": 0.1 * jax.random.normal(ks[3], (planes * 4, planes, 1, 1), jnp.float32),
        "g1": 1.0 + 0.1 * jax.random.normal(ks[4], (planes,), jnp.float32),
        "b1": 0.1 * jax.random.normal(ks[5], (planes,), jnp.float32),
        "g2": 1.0 + 0.1 * jax.random.normal(ks[6], (planes,), jnp.float32),
        "b2": 0.1 * jax.random.normal(ks[7], (planes,), jnp.float32),
        "g3": 1.0 + 0.1 * jax.random.normal(ks[8], (planes * 4,), jnp.float32),
        "b3": 0.1 * jax.random.normal(ks[9], (planes * 4,), jnp.float32),
    }

    ref = jax.block_until_ready(_ref_forward(x, params))

    # Fast path: bf16 activations/operands + f32 accumulation / BN statistics.
    # Training-mode BN divides by the per-batch std of a 4-channel toy conv,
    # which amplifies bf16 rounding at these tiny shapes, so only a coarse
    # structural sanity bound is checked here; the strict numerical gate is
    # the f32 run below.
    out_bf16 = jax.block_until_ready(bottleneck_forward(x, params))
    assert out_bf16.shape == (N, planes * 4, H, W)
    assert bool(jnp.all(jnp.isfinite(out_bf16))), "non-finite output (bf16 path)"
    max_err_bf16 = float(jnp.max(jnp.abs(out_bf16 - ref)))
    mean_err_bf16 = float(jnp.mean(jnp.abs(out_bf16 - ref)))
    assert mean_err_bf16 < 7.5e-2, f"bf16 path mean mismatch: {mean_err_bf16}"
    assert max_err_bf16 < 1.0, f"bf16 path structural mismatch: {max_err_bf16}"

    # Strict check: f32 everywhere (also exercises multi-row-tile halo logic).
    out_f32 = jax.block_until_ready(
        bottleneck_forward(x, params, compute_dtype=jnp.float32, tile_h=8))
    max_err_f32 = float(jnp.max(jnp.abs(out_f32 - ref)))
    assert max_err_f32 < 1e-3, f"f32 path mismatch: max_err={max_err_f32}"

    print("KERNEL_OK")
</pallas_src>

<mosaic_0001>
module attributes {stable_mosaic.version = 11 : i64} {
  func.func @_conv1x1_stats_kernel(%arg0: i32, %arg1: i32, %arg2: memref<1x16x16x128xbf16, #tpu.memory_space<vmem>>, %arg3: memref<128x128xbf16, #tpu.memory_space<vmem>>, %arg4: memref<1x16x16x128xbf16, #tpu.memory_space<vmem>>, %arg5: memref<1x1x1x128xf32, #tpu.memory_space<vmem>>, %arg6: memref<1x1x1x128xf32, #tpu.memory_space<vmem>>) attributes {dimension_semantics = [#tpu.dimension_semantics<parallel>, #tpu.dimension_semantics<parallel>], iteration_bounds = array<i64: 2, 1>, scalar_prefetch = 0 : i64, scratch_operands = 0 : i64, tpu.core_type = #tpu.core_type<tc>, window_params = [{transform_indices = @transform_0, window_bounds = array<i64: 1, 16, 16, 128>}, {pipeline_mode = #tpu.pipeline_mode<synchronous>, transform_indices = @transform_1, window_bounds = array<i64: 128, 128>}, {transform_indices = @transform_2, window_bounds = array<i64: 1, 16, 16, 128>}, {transform_indices = @transform_3, window_bounds = array<i64: 1, 1, 1, 128>}, {transform_indices = @transform_4, window_bounds = array<i64: 1, 1, 1, 128>}]} {
    %c0 = arith.constant 0 : index
    %c0_0 = arith.constant 0 : index
    %c0_1 = arith.constant 0 : index
    %c0_2 = arith.constant 0 : index
    %0 = vector.load %arg2[%c0, %c0_0, %c0_1, %c0_2] : memref<1x16x16x128xbf16, #tpu.memory_space<vmem>>, vector<1x16x16x128xbf16>
    %1 = vector.shape_cast %0 : vector<1x16x16x128xbf16> to vector<256x128xbf16>
    %c0_3 = arith.constant 0 : index
    %c0_4 = arith.constant 0 : index
    %2 = vector.load %arg3[%c0_3, %c0_4] : memref<128x128xbf16, #tpu.memory_space<vmem>>, vector<128x128xbf16>
    %cst = arith.constant dense<0.000000e+00> : vector<256x128xf32>
    %3 = tpu.matmul %1, %2, %cst {dimension_numbers = #tpu.dot_dimension_numbers<[1], [0], [0], [1], [0, 0, 1, 1], [], []>} : vector<256x128xbf16>, vector<128x128xbf16>, vector<256x128xf32> -> vector<256x128xf32>
    %4 = vector.shape_cast %3 : vector<256x128xf32> to vector<1x16x16x128xf32>
    %5 = arith.truncf %4 : vector<1x16x16x128xf32> to vector<1x16x16x128xbf16>
    %c0_5 = arith.constant 0 : index
    %c0_6 = arith.constant 0 : index
    %c0_7 = arith.constant 0 : index
    %c0_8 = arith.constant 0 : index
    %6 = vector.load %arg4[%c0_5, %c0_6, %c0_7, %c0_8] : memref<1x16x16x128xbf16, #tpu.memory_space<vmem>>, vector<1x16x16x128xbf16>
    tpu.vector_store %arg4[%c0_5, %c0_6, %c0_7, %c0_8], %5 {strides = array<i32>} : memref<1x16x16x128xbf16, #tpu.memory_space<vmem>>, vector<1x16x16x128xbf16>,
    %cst_9 = arith.constant dense<0.000000e+00> : vector<128xf32>
    %7 = vector.multi_reduction <add>, %3, %cst_9 [0] : vector<256x128xf32> to vector<128xf32>
    %8 = vector.shape_cast %7 : vector<128xf32> to vector<1x1x1x128xf32>
    %c0_10 = arith.constant 0 : index
    %c0_11 = arith.constant 0 : index
    %c0_12 = arith.constant 0 : index
    %c0_13 = arith.constant 0 : index
    %9 = vector.load %arg5[%c0_10, %c0_11, %c0_12, %c0_13] : memref<1x1x1x128xf32, #tpu.memory_space<vmem>>, vector<1x1x1x128xf32>
    tpu.vector_store %arg5[%c0_10, %c0_11, %c0_12, %c0_13], %8 {strides = array<i32>} : memref<1x1x1x128xf32, #tpu.memory_space<vmem>>, vector<1x1x1x128xf32>,
    %10 = arith.mulf %3, %3 : vector<256x128xf32>
    %cst_14 = arith.constant dense<0.000000e+00> : vector<128xf32>
    %11 = vector.multi_reduction <add>, %10, %cst_14 [0] : vector<256x128xf32> to vector<128xf32>
    %12 = vector.shape_cast %11 : vector<128xf32> to vector<1x1x1x128xf32>
    %c0_15 = arith.constant 0 : index
    %c0_16 = arith.constant 0 : index
    %c0_17 = arith.constant 0 : index
    %c0_18 = arith.constant 0 : index
    %13 = vector.load %arg6[%c0_15, %c0_16, %c0_17, %c0_18] : memref<1x1x1x128xf32, #tpu.memory_space<vmem>>, vector<1x1x1x128xf32>
    tpu.vector_store %arg6[%c0_15, %c0_16, %c0_17, %c0_18], %12 {strides = array<i32>} : memref<1x1x1x128xf32, #tpu.memory_space<vmem>>, vector<1x1x1x128xf32>,
    return
  }
  func.func @transform_0(%arg0: i32, %arg1: i32) -> (i32, i32, i32, i32) {
    %c0_i32 = arith.constant 0 : i32
    %c0_i32_0 = arith.constant 0 : i32
    %c0_i32_1 = arith.constant 0 : i32
    return %arg0, %arg1, %c0_i32, %c0_i32_0 : i32, i32, i32, i32
  }
  func.func @transform_1(%arg0: i32, %arg1: i32) -> (i32, i32) {
    %c0_i32 = arith.constant 0 : i32
    %c0_i32_0 = arith.constant 0 : i32
    %c0_i32_1 = arith.constant 0 : i32
    return %c0_i32, %c0_i32_0 : i32, i32
  }
  func.func @transform_2(%arg0: i32, %arg1: i32) -> (i32, i32, i32, i32) {
    %c0_i32 = arith.constant 0 : i32
    %c0_i32_0 = arith.constant 0 : i32
    %c0_i32_1 = arith.constant 0 : i32
    return %arg0, %arg1, %c0_i32, %c0_i32_0 : i32, i32, i32, i32
  }
  func.func @transform_3(%arg0: i32, %arg1: i32) -> (i32, i32, i32, i32) {
    %c0_i32 = arith.constant 0 : i32
    %c0_i32_0 = arith.constant 0 : i32
    %c0_i32_1 = arith.constant 0 : i32
    return %arg0, %arg1, %c0_i32, %c0_i32_0 : i32, i32, i32, i32
  }
  func.func @transform_4(%arg0: i32, %arg1: i32) -> (i32, i32, i32, i32) {
    %c0_i32 = arith.constant 0 : i32
    %c0_i32_0 = arith.constant 0 : i32
    %c0_i32_1 = arith.constant 0 : i32
    return %arg0, %arg1, %c0_i32, %c0_i32_0 : i32, i32, i32, i32
  }
}

</mosaic_0001>

<bundles_post_ra>
// kernel: tpu_custom_call.1
= control target key start
LH: loop header
LB: loop body
LE: loop exit
PB: predicated region body
PF: predicated region fallthrough
CT: control target
= control target key end

     0   :  { %10 = vsyncpa [#allocation3], 0  ;;  %s2172_s0 = inlined_call_operand.hbm [shape: bf16[2,16,16,128], index: 0, kind: input, shape index: {}]   ;;  %s2173_s1 = inlined_call_operand.hbm [shape: bf16[128,128], index: 1, kind: input, shape index: {}]   ;;  %s2174_s2 = inlined_call_operand.hbm [shape: bf16[2,16,16,128], index: 2, kind: output, shape index: {0}]   ;;  %s2175_s3 = inlined_call_operand.hbm [shape: f32[2,1,1,128], index: 3, kind: output, shape index: {1}]   ;;  %s2176_s4 = inlined_call_operand.hbm [shape: f32[2,1,1,128], index: 4, kind: output, shape index: {2}]  }
   0x1   :  { %12 = vsyncpa [#allocation3 + $0x1], 0 }
   0x2   :  { %13 = vsyncpa [#allocation6], 0 }
   0x3   :  { %14 = vsyncpa [#allocation4], 0 }
   0x4   :  { %16 = vsyncpa [#allocation4 + $0x1], 0 }
   0x5   :  { %17 = vsyncpa [#allocation9], 0 }
   0x6   :  { %19 = vsyncpa [#allocation9 + $0x1], 0  ;;  %s1742_s15 = smov 0   ;;  %s1744_s16 = smov 0  }
   0x7   :  { %s1746_s17 = smov 0   ;;  %s1748_s18 = smov 0  }
   0x8   :  { %s1750_s19 = smov 0   ;;  %s1752_s20 = smov 0  }
   0x9 LB: > { %s1773_s21 = sadd.s32 4294967295, %s1706_s20   ;;  %s2180_s22 = sadd.s32 4294967294, %s1706_s20   ;;  %s1706_s20 = sphi %s1752_s20, %s25_s20   ;;  %s1702_s19 = sphi %s1750_s19, %s2200_s19   ;;  %s1698_s18 = sphi %s1748_s18, %s2199_s18   ;;  %s1694_s17 = sphi %s1746_s17, %s2198_s17   ;;  %s1690_s16 = sphi %s1744_s16, %s2197_s16   ;;  %s1686_s15 = sphi %s1742_s15, %s2196_s15  }
   0xa   : > { %p59_p0 = scmp.ne.s32.totalorder %s1690_s16, %s1686_s15  ;;  %p2177_p1 = scmp.eq.s32.totalorder %s1773_s21, 0 }
   0xb   : > { %p112_p3 = scmp.eq.s32.totalorder %s2180_s22, 1  ;;  %p1101_p5 = scmp.ge.s32.totalorder %s1706_s20, 1 }
   0xc   : > { %p1784_p4 = por %p2177_p1, %p59_p0  ;;  %p175_p7 = scmp.lt.s32.totalorder %s1706_s20, 3 }
   0xd   : > { %p1789_p6 = por %p112_p3, %p59_p0  ;;  %s1708_s26 = smov [#allocation5]  }
   0xe   : > { %s2181_s23 = scalar_select %p1784_p4, 1, 0 }
   0xf   : > { %s2182_s24 = scalar_select %p1789_p6, 1, 0 }
  0x10   : > { %p1794_p8 = pnand %p1101_p5, %p175_p7  ;;  %s187_s27 = sshll.u32 %s1708_s26, 4  ;;  %s188_s27 = int_to_ptr.vmem [resolvable:$true] %s187_s27 }
  0x11   : > { %s37_s29 = sadd.s32 1, %s1702_s19  ;;  %s1502_s6 = scalar_lea.hbm %s2173_s1, 1024 }
  0x12   : > { %s2183_s25 = scalar_select %p1794_p8, 1, 0 }
  0x13   : > { %p1403_p9 = pneg %p1794_p8  ;;  %p1503_p12 = scmp.ne.s32.totalorder %s2173_s1, %s1502_s6 }
  0x14   : > { %p1509_p5 = scmp.lt.u32.totalorder %s1502_s6, %s2173_s1 }
  0x15   : > { %p1803_p11 = pnand %p1403_p9, %p2177_p1 }
  0x17   : > { %p1504_p13 = pneg %p1803_p11 }
  0x19   : > { %p1505_p0 = pnand %p1504_p13, %p1503_p12 }
  0x1b   : > { %p1506_p3 = pneg %p1505_p0 }
  0x1d   : > { %p1511_p7 = pnand %p1509_p5, %p1506_p3 }
  0x1f   : > { %1514 = shalt.err (!%p1511_p7)
}
  0x20   : > { %s1515_s11 = scalar_lea.vmem %s188_s27, 1024  ;;  %p1523_p2 = scmp.lt.s32.totalorder %s188_s27, %s188_s27 }
  0x21   : > { %p1516_p9 = scmp.ne.s32.totalorder %s188_s27, %s1515_s11  ;;  %p1524_p6 = scmp.lt.s32.totalorder %s1515_s11, %s1515_s11 }
  0x23   : > { %p1518_p10 = pnand %p1516_p9, %p1504_p13  ;;  %p1525_p4 = por %p1524_p6, %p1523_p2 }
  0x25   : > { %p1519_p1 = pneg %p1518_p10 }
  0x27   : > { %p1526_p8 = pnand %p1525_p4, %p1519_p1 }
  0x29   : > { %1529 = shalt.err (!%p1526_p8)
}
  0x2a   : > { %s1709_s12 = smov 64   ;;  %s1710_s13 = smov 4  }
  0x2b   : > { %1406 = dma.hbm_to_vmem [thread:$0]  (!%p1803_p11), %s2173_s1, 1024, %s188_s27, [#allocation6], %s1709_s12, %s1709_s12, %s1710_s13  }
  0x2c   : > { %p39_p1 = scmp.ge.s32.totalorder %s37_s29, 2  ;;  %s46_s30 = sadd.s32 1, %s1694_s17 }
  0x2d   : > { %p53_p2 = scmp.ne.s32.totalorder %s1694_s17, %s1690_s16  ;;  %p54_p4 = scmp.eq.s32.totalorder %s1706_s20, 0 }
  0x2e   : > { %s2202_s29 = smov (%p39_p1, %s37_s29), 0  ;;  %p2186_p8 = scmp.eq.s32.totalorder %s1773_s21, 1 }
  0x2f   : > { %p1833_p6 = por %p54_p4, %p53_p2  ;;  %s41_s6 = ssub.s32 %s1702_s19, %s2202_s29 }
  0x30   : > { %p1839_p10 = por %p2186_p8, %p53_p2  ;;  %p1422_p12 = scmp.lt.s32.totalorder %s1706_s20, 2 }
  0x31   : > { %p44_p11 = scmp.eq.s32.totalorder %s41_s6, 0  ;;  %s201_s27 = sand.u32 1, %s1694_s17  }
  0x32   : > { %s1104_s7 = sshll.u32 %s201_s27, 7  ;;  %s1174_s9 = sshll.u32 %s1702_s19, 11 }
  0x33   : > { %s1848_s8 = scalar_select %p44_p11, %s1694_s17, %s46_s30  }
  0x34   : > { %s1854_s14 = scalar_lea.hbm %s2172_s0, %s1174_s9  ;;  %s205_s26 = scalar_lea.vmem [#allocation2], %s1104_s7 }
  0x35   : > { %s215_s22 = sshll.u32 %s205_s26, 4  ;;  %p1860_p13 = pnand %p1422_p12, %p1833_p6  ;;  %s1856_s22 = int_to_ptr.vmem [resolvable:$true] %s215_s22 }
  0x36   : > { %s1864_s30 = scalar_lea.sflag [#allocation3], %s201_s27  ;;  %s1530_s10 = scalar_lea.hbm %s1854_s14, 2048 }
  0x37   : > { %p1531_p0 = scmp.ne.s32.totalorder %s1854_s14, %s1530_s10  ;;  %p1532_p3 = pneg %p1860_p13 }
  0x38   : > { %s1535_s5 = scalar_lea.hbm %s2172_s0, 4096  ;;  %p1536_p9 = scmp.lt.u32.totalorder %s1854_s14, %s2172_s0 }
  0x39   : > { %p1533_p5 = pnand %p1532_p3, %p1531_p0  ;;  %p1537_p1 = scmp.lt.u32.totalorder %s1535_s5, %s1530_s10 }
  0x3a   : > { %p1539_p4 = scmp.lt.u32.totalorder %s1530_s10, %s1854_s14 }
  0x3b   : > { %p1534_p7 = pneg %p1533_p5  ;;  %p1538_p2 = por %p1537_p1, %p1536_p9 }
  0x3d   : > { %p1540_p6 = por %p1539_p4, %p1538_p2 }
  0x3f   : > { %p1541_p8 = pnand %p1540_p6, %p1534_p7 }
  0x41   : > { %1544 = shalt.err (!%p1541_p8)
}
  0x42   : > { %s1545_s27 = scalar_lea.vmem %s1856_s22, 2048  ;;  %s1711_s7 = smov [#allocation2]  }
  0x43   : > { %p1546_p12 = scmp.ne.s32.totalorder %s1856_s22, %s1545_s27  ;;  %s1550_s9 = sshll.u32 %s1711_s7, 4  ;;  %s1551_s9 = int_to_ptr.vmem [resolvable:$false] %s1550_s9 }
  0x44   : > { %s1552_s11 = scalar_lea.vmem %s1551_s9, 4096  ;;  %p1553_p5 = scmp.lt.s32.totalorder %s1856_s22, %s1551_s9 }
  0x45   : > { %p1548_p11 = pnand %p1546_p12, %p1532_p3  ;;  %p1554_p9 = scmp.lt.s32.totalorder %s1552_s11, %s1545_s27 }
  0x47   : > { %p1549_p0 = pneg %p1548_p11  ;;  %p1555_p1 = por %p1554_p9, %p1553_p5 }
  0x49   : > { %p1556_p2 = pnand %p1555_p1, %p1549_p0 }
  0x4b   : > { %1559 = shalt.err (!%p1556_p2)
}
  0x4c   : > { %1410 = dma.hbm_to_vmem [thread:$0]  (!%p1860_p13), %s1854_s14, 2048, %s1856_s22, %s1864_s30, %s1709_s12, %s1709_s12, %s1710_s13  }
  0x4d   : > { %p2189_p3 = scmp.ne.s32.totalorder %s2183_s25, 0 }
  0x4e   : > { %s1898_s10 = sand.u32 (!%p2189_p3), 1, %s1690_s16   ;;  %p2190_p7 = scmp.ne.s32.totalorder (!%p2189_p3), %s2181_s23, 0 }
  0x4f   : > { %227 = sbr.rel (%p2189_p3) target bundleno = 459 (0x1cb), region = 28  ;;  %s1108_s5 = sshll.u32 (!%p2189_p3), %s1898_s10, 7 }
  0x50   : > { %s230_s26 = scalar_lea.sflag (!%p2189_p3), [#allocation3], %s1898_s10  ;;  %s1904_s6 = scalar_lea.vmem (!%p2189_p3), [#allocation2], %s1108_s5 }
  0x56   : > { %1669 = dma.done.wait (%p2190_p7), %s230_s26, 2048  }
  0x57   : > { %1671 = vsyncadd (%p2190_p7), %s230_s26, 4294965248  ;;  %p2191_p13 = scmp.eq.s32.totalorder %s1773_s21, 0 }
  0x59   : > { %1673 = dma.done.wait (%p2191_p13), [#allocation6], 1024   ;;  %p2192_p4 = pmov %p2191_p13 }
  0x5a   : > { %v1478_v0 = vld [vmem:[#allocation5] sm:$0xff]   ;;  %v1479_v1 = vld [vmem:[#allocation5 + $0x8] sm:$0xff]   ;;  %v1480_v2 = vld [vmem:[#allocation5 + $0x10] sm:$0xff]   ;;  %s1944_s22 = scalar_lea.vmem [#allocation7], %s1108_s5  ;;  %s1207_s23 = sshll.u32 %s1698_s18, 11 }
  0x5b   : > { %1675 = vsyncadd (%p2192_p4), [#allocation6], 4294966272  ;;  %1327 = vmatprep.subr.bf16.mxu0 %v1478_v0  ;;  %1375 = vmatprep.subr.bf16.mxu1 %v1478_v0  ;;  %v1481_v3 = vld [vmem:[#allocation5 + $0x18] sm:$0xff]   ;;  %v1486_v4 = vld [vmem:[%s1904_s6] sm:$0xff]   ;;  %s919_s25 = sshll.u32 %s1944_s22, 4  ;;  %s1997_s14 = scalar_lea.hbm %s2174_s2, %s1207_s23  ;;  %s1999_s25 = int_to_ptr.vmem [resolvable:$true] %s919_s25 }
  0x5c   : > { %1328 = vmatpush3.bf16.msra.mxu0 %v1478_v0  ;;  %1383 = vmatpush3.bf16.msra.mxu1 %v1478_v0  ;;  %v1482_v5 = vld [vmem:[#allocation5 + $0x20] sm:$0xff]   ;;  %v1483_v6 = vld [vmem:[#allocation5 + $0x28] sm:$0xff]   ;;  %v1484_v8 = vld [vmem:[#allocation5 + $0x30] sm:$0xff]   ;;  %s895_s30 = scalar_lea.sflag [#allocation4], %s1898_s10  ;;  %s1560_s27 = scalar_lea.vmem %s1999_s25, 2048 }
  0x5d   : > { %1329 = vmatprep.subr.bf16.mxu0 %v1479_v1  ;;  %1376 = vmatprep.subr.bf16.mxu1 %v1479_v1  ;;  %v1494_v7 = vld [vmem:[%s1904_s6 + $0x40] sm:$0xff]   ;;  %v1485_v9 = vld [vmem:[#allocation5 + $0x38] sm:$0xff]   ;;  %v1487_v10 = vld [vmem:[%s1904_s6 + $0x8] sm:$0xff]   ;;  %p1561_p6 = scmp.ne.s32.totalorder %s1999_s25, %s1560_s27  ;;  %s1712_s7 = smov [#allocation7]  }
  0x5e   : > { %1343 = vmatprep.mubr.bf16.mxu0 %v1486_v4  ;;  %1359 = vmatprep.mubr.bf16.mxu1 %v1494_v7  ;;  %v1495_v11 = vld [vmem:[%s1904_s6 + $0x48] sm:$0xff]   ;;  %v1488_v12 = vld [vmem:[%s1904_s6 + $0x10] sm:$0xff]   ;;  %v1489_v14 = vld [vmem:[%s1904_s6 + $0x18] sm:$0xff]   ;;  %s1564_s9 = sshll.u32 %s1712_s7, 4  ;;  %s1565_s9 = int_to_ptr.vmem [resolvable:$false] %s1564_s9 }
  0x5f   : > { %v1496_v13 = vld [vmem:[%s1904_s6 + $0x50] sm:$0xff]   ;;  %v1497_v15 = vld [vmem:[%s1904_s6 + $0x58] sm:$0xff]   ;;  %v1490_v16 = vld [vmem:[%s1904_s6 + $0x20] sm:$0xff]   ;;  %p1562_p8 = pnand %p1561_p6, %p1839_p10  ;;  %s1566_s11 = scalar_lea.vmem %s1565_s9, 4096 }
  0x60   : > { %1330 = vmatpush3.bf16.msra.mxu0 %v1479_v1  ;;  %1384 = vmatpush3.bf16.msra.mxu1 %v1479_v1  ;;  %v1498_v17 = vld [vmem:[%s1904_s6 + $0x60] sm:$0xff]   ;;  %v1491_v18 = vld [vmem:[%s1904_s6 + $0x28] sm:$0xff]   ;;  %v1492_v20 = vld [vmem:[%s1904_s6 + $0x30] sm:$0xff]   ;;  %p1567_p11 = scmp.lt.s32.totalorder %s1999_s25, %s1565_s9  ;;  %p1568_p0 = scmp.lt.s32.totalorder %s1566_s11, %s1560_s27 }
  0x61   : > { %1331 = vmatprep.subr.bf16.mxu0 %v1480_v2  ;;  %1377 = vmatprep.subr.bf16.mxu1 %v1480_v2  ;;  %v1499_v19 = vld [vmem:[%s1904_s6 + $0x68] sm:$0xff]   ;;  %v1500_v21 = vld [vmem:[%s1904_s6 + $0x70] sm:$0xff]   ;;  %v1493_v22 = vld [vmem:[%s1904_s6 + $0x38] sm:$0xff]   ;;  %p1563_p12 = pneg %p1562_p8 }
  0x62   : > { %v1501_v23 = vld [vmem:[%s1904_s6 + $0x78] sm:$0xff]   ;;  %p1569_p5 = por %p1568_p0, %p1567_p11 }
  0x64   : > { %1332 = vmatpush3.bf16.msra.mxu0 %v1480_v2  ;;  %1385 = vmatpush3.bf16.msra.mxu1 %v1480_v2  ;;  %p1570_p9 = pnand %p1569_p5, %p1563_p12 }
  0x65   : > { %1333 = vmatprep.subr.bf16.mxu0 %v1481_v3  ;;  %1378 = vmatprep.subr.bf16.mxu1 %v1481_v3 }
  0x68   : > { %1334 = vmatpush3.bf16.msra.mxu0 %v1481_v3  ;;  %1386 = vmatpush3.bf16.msra.mxu1 %v1481_v3 }
  0x69   : > { %1335 = vmatprep.subr.bf16.mxu0 %v1482_v5  ;;  %1379 = vmatprep.subr.bf16.mxu1 %v1482_v5 }
  0x6c   : > { %1336 = vmatpush3.bf16.msra.mxu0 %v1482_v5  ;;  %1387 = vmatpush3.bf16.msra.mxu1 %v1482_v5 }
  0x6d   : > { %1337 = vmatprep.subr.bf16.mxu0 %v1483_v6  ;;  %1380 = vmatprep.subr.bf16.mxu1 %v1483_v6 }
  0x70   : > { %1338 = vmatpush3.bf16.msra.mxu0 %v1483_v6  ;;  %1388 = vmatpush3.bf16.msra.mxu1 %v1483_v6 }
  0x71   : > { %1339 = vmatprep.subr.bf16.mxu0 %v1484_v8  ;;  %1381 = vmatprep.subr.bf16.mxu1 %v1484_v8 }
  0x74   : > { %1340 = vmatpush3.bf16.msra.mxu0 %v1484_v8  ;;  %1389 = vmatpush3.bf16.msra.mxu1 %v1484_v8 }
  0x75   : > { %1341 = vmatprep.subr.bf16.mxu0 %v1485_v9  ;;  %1382 = vmatprep.subr.bf16.mxu1 %v1485_v9 }
  0x78   : > { %1342 = vmatpush3.bf16.msra.mxu0 %v1485_v9  ;;  %1390 = vmatpush3.bf16.msra.mxu1 %v1485_v9 }
  0x7b   : > { %1344 = vmatmul.mubr.bf16.vlgmr.msra.gmra.mrb[0].mxu0 %v1487_v10  ;;  %1360 = vmatmul.mubr.bf16.vlgmr.msra.gmra.mrb[0].mxu1 %v1495_v11 }
  0x7c   : > { %1347 = vmatprep.mubr.bf16.mxu0 %v1488_v12  ;;  %1363 = vmatprep.mubr.bf16.mxu1 %v1496_v13 }
  0x83   : > { %1348 = vmatmul.mubr.bf16.gmra.mrb[4].mxu0 %v1489_v14  ;;  %1364 = vmatmul.mubr.bf16.gmra.mrb[4].mxu1 %v1497_v15 }
  0x84   : > { %1351 = vmatprep.mubr.bf16.mxu0 %v1490_v16  ;;  %1367 = vmatprep.mubr.bf16.mxu1 %v1498_v17 }
  0x8b   : > { %1352 = vmatmul.mubr.bf16.gmra.mrb[8].mxu0 %v1491_v18  ;;  %1368 = vmatmul.mubr.bf16.gmra.mrb[8].mxu1 %v1499_v19 }
  0x8c   : > { %1355 = vmatprep.mubr.bf16.mxu0 %v1492_v20  ;;  %1371 = vmatprep.mubr.bf16.mxu1 %v1500_v21 }
  0x93   : > { %1356 = vmatmul.mubr.bf16.gmra.mrb[12].mxu0 %v1493_v22  ;;  %1372 = vmatmul.mubr.bf16.gmra.mrb[12].mxu1 %v1501_v23 }
 0x14e   : > { %v1345_v24 = vpop.f32.mrb[0].mxu0  ;;  %v1930_v25 = vpop.f32.mrb[0].mxu1 }
 0x14f   : > { %v499_v26 = vpop.f32.mrb[1].mxu0  ;;  %v1932_v27 = vpop.f32.mrb[1].mxu1  ;;  %v826_v39 = vmul.f32 %v1345_v24, %v1345_v24 }
 0x150   : > { %v1346_v28 = vpop.f32.mrb[2].mxu0  ;;  %v1934_v29 = vpop.f32.mrb[2].mxu1  ;;  %v824_v30 = vmul.f32 %v499_v26, %v499_v26 }
 0x151   : > { %v1216_v31 = vpack.c.bf16 %v1346_v28, %v1345_v24  ;;  %v502_v32 = vpop.f32.mrb[3].mxu0  ;;  %v1256_v33 = vpack.c.bf16 %v1934_v29, %v1930_v25  ;;  %v1938_v34 = vpop.f32.mrb[3].mxu1  ;;  %v827_v42 = vmul.f32 %v1346_v28, %v1346_v28 }
 0x152   : > { %v1211_v35 = vpack.c.bf16 %v502_v32, %v499_v26  ;;  %v786_v36 = vadd.f32 %v502_v32, %v499_v26  ;;  %v825_v37 = vmul.f32 %v502_v32, %v502_v32  ;;  %v1251_v38 = vpack.c.bf16 %v1938_v34, %v1932_v27 }
 0x153   : > { %1288 = vst [vmem:[%s1944_s22 + $0x8] sm:$0xff] %v1216_v31   ;;  %1296 = vst [vmem:[%s1944_s22 + $0x48] sm:$0xff] %v1256_v33  }
 0x154   : > { %1212 = vst [vmem:[%s1944_s22] sm:$0xff] %v1211_v35   ;;  %v787_v40 = vadd.f32 %v1345_v24, %v786_v36  ;;  %v856_v41 = vadd.f32 %v825_v37, %v824_v30  ;;  %1295 = vst [vmem:[%s1944_s22 + $0x40] sm:$0xff] %v1251_v38  }
 0x156   : > { %v857_v43 = vadd.f32 %v856_v41, %v826_v39  ;;  %v1349_v44 = vpop.f32.mrb[4].mxu0  ;;  %v788_v45 = vadd.f32 %v1346_v28, %v787_v40  ;;  %v1950_v46 = vpop.f32.mrb[4].mxu1 }
 0x157   : > { %v515_v47 = vpop.f32.mrb[5].mxu0  ;;  %v1952_v48 = vpop.f32.mrb[5].mxu1  ;;  %v830_v63 = vmul.f32 %v1349_v44, %v1349_v44 }
 0x158   : > { %v789_v49 = vadd.f32 %v788_v45, %v515_v47  ;;  %v828_v50 = vmul.f32 %v515_v47, %v515_v47  ;;  %v858_v51 = vadd.f32 %v857_v43, %v827_v42  ;;  %v1350_v52 = vpop.f32.mrb[6].mxu0  ;;  %v1954_v53 = vpop.f32.mrb[6].mxu1 }
 0x159   : > { %v1226_v54 = vpack.c.bf16 %v1350_v52, %v1349_v44  ;;  %v518_v55 = vpop.f32.mrb[7].mxu0  ;;  %v1266_v56 = vpack.c.bf16 %v1954_v53, %v1950_v46  ;;  %v1958_v57 = vpop.f32.mrb[7].mxu1  ;;  %v831_v2 = vmul.f32 %v1350_v52, %v1350_v52 }
 0x15a   : > { %v859_v58 = vadd.f32 %v858_v51, %v828_v50  ;;  %v1221_v59 = vpack.c.bf16 %v518_v55, %v515_v47  ;;  %v790_v60 = vadd.f32 %v789_v49, %v518_v55  ;;  %v829_v61 = vmul.f32 %v518_v55, %v518_v55 }
 0x15b   : > { %1290 = vst [vmem:[%s1944_s22 + $0x18] sm:$0xff] %v1226_v54   ;;  %1298 = vst [vmem:[%s1944_s22 + $0x58] sm:$0xff] %v1266_v56   ;;  %v1261_v62 = vpack.c.bf16 %v1958_v57, %v1952_v48 }
 0x15c   : > { %1289 = vst [vmem:[%s1944_s22 + $0x10] sm:$0xff] %v1221_v59   ;;  %v791_v0 = vadd.f32 %v1349_v44, %v790_v60  ;;  %v860_v1 = vadd.f32 %v859_v58, %v829_v61  ;;  %v840_v61 = vmul.f32 %v1932_v27, %v1932_v27 }
 0x15d   : > { %1297 = vst [vmem:[%s1944_s22 + $0x50] sm:$0xff] %v1261_v62  }
 0x15e   : > { %v861_v3 = vadd.f32 %v860_v1, %v830_v63  ;;  %v1353_v4 = vpop.f32.mrb[8].mxu0  ;;  %v792_v5 = vadd.f32 %v1350_v52, %v791_v0  ;;  %v1966_v6 = vpop.f32.mrb[8].mxu1 }
 0x15f   : > { %v531_v7 = vpop.f32.mrb[9].mxu0  ;;  %v1968_v8 = vpop.f32.mrb[9].mxu1  ;;  %v834_v23 = vmul.f32 %v1353_v4, %v1353_v4 }
 0x160   : > { %v793_v9 = vadd.f32 %v792_v5, %v531_v7  ;;  %v832_v10 = vmul.f32 %v531_v7, %v531_v7  ;;  %v862_v11 = vadd.f32 %v861_v3, %v831_v2  ;;  %v1354_v12 = vpop.f32.mrb[10].mxu0  ;;  %v1970_v13 = vpop.f32.mrb[10].mxu1 }
 0x161   : > { %v1236_v14 = vpack.c.bf16 %v1354_v12, %v1353_v4  ;;  %v534_v15 = vpop.f32.mrb[11].mxu0  ;;  %v1276_v16 = vpack.c.bf16 %v1970_v13, %v1966_v6  ;;  %v1974_v17 = vpop.f32.mrb[11].mxu1  ;;  %v835_v28 = vmul.f32 %v1354_v12, %v1354_v12 }
 0x162   : > { %v863_v18 = vadd.f32 %v862_v11, %v832_v10  ;;  %v1231_v19 = vpack.c.bf16 %v534_v15, %v531_v7  ;;  %v794_v20 = vadd.f32 %v793_v9, %v534_v15  ;;  %v833_v21 = vmul.f32 %v534_v15, %v534_v15 }
 0x163   : > { %1292 = vst [vmem:[%s1944_s22 + $0x28] sm:$0xff] %v1236_v14   ;;  %1300 = vst [vmem:[%s1944_s22 + $0x68] sm:$0xff] %v1276_v16   ;;  %v1271_v22 = vpack.c.bf16 %v1974_v17, %v1968_v8 }
 0x164   : > { %1291 = vst [vmem:[%s1944_s22 + $0x20] sm:$0xff] %v1231_v19   ;;  %v795_v24 = vadd.f32 %v1353_v4, %v794_v20  ;;  %v864_v26 = vadd.f32 %v863_v18, %v833_v21 }
 0x165   : > { %1299 = vst [vmem:[%s1944_s22 + $0x60] sm:$0xff] %v1271_v22  }
 0x166   : > { %v865_v30 = vadd.f32 %v864_v26, %v834_v23  ;;  %v1357_v31 = vpop.f32.mrb[12].mxu0  ;;  %v796_v32 = vadd.f32 %v1354_v12, %v795_v24  ;;  %v1982_v33 = vpop.f32.mrb[12].mxu1 }
 0x167   : > { %v547_v35 = vpop.f32.mrb[13].mxu0  ;;  %v1984_v36 = vpop.f32.mrb[13].mxu1  ;;  %v838_v54 = vmul.f32 %v1357_v31, %v1357_v31 }
 0x168   : > { %v797_v37 = vadd.f32 %v796_v32, %v547_v35  ;;  %v836_v38 = vmul.f32 %v547_v35, %v547_v35  ;;  %v866_v39 = vadd.f32 %v865_v30, %v835_v28  ;;  %v1358_v40 = vpop.f32.mrb[14].mxu0  ;;  %v1988_v41 = vpop.f32.mrb[14].mxu1 }
 0x169   : > { %v1246_v42 = vpack.c.bf16 %v1358_v40, %v1357_v31  ;;  %v550_v43 = vpop.f32.mrb[15].mxu0  ;;  %v1286_v44 = vpack.c.bf16 %v1988_v41, %v1982_v33  ;;  %v1992_v45 = vpop.f32.mrb[15].mxu1  ;;  %v839_v58 = vmul.f32 %v1358_v40, %v1358_v40 }
 0x16a   : > { %v867_v47 = vadd.f32 %v866_v39, %v836_v38  ;;  %v1241_v49 = vpack.c.bf16 %v550_v43, %v547_v35  ;;  %v798_v50 = vadd.f32 %v797_v37, %v550_v43  ;;  %v837_v51 = vmul.f32 %v550_v43, %v550_v43 }
 0x16b   : > { %1294 = vst [vmem:[%s1944_s22 + $0x38] sm:$0xff] %v1246_v42   ;;  %1302 = vst [vmem:[%s1944_s22 + $0x78] sm:$0xff] %v1286_v44   ;;  %v1281_v52 = vpack.c.bf16 %v1992_v45, %v1984_v36 }
 0x16c   : > { %1293 = vst [vmem:[%s1944_s22 + $0x30] sm:$0xff] %v1241_v49   ;;  %v799_v55 = vadd.f32 %v1357_v31, %v798_v50  ;;  %v868_v56 = vadd.f32 %v867_v47, %v837_v51 }
 0x16d   : > { %1301 = vst [vmem:[%s1944_s22 + $0x70] sm:$0xff] %v1281_v52  }
 0x16e   : > { %v869_v59 = vadd.f32 %v868_v56, %v838_v54  ;;  %v800_v60 = vadd.f32 %v1358_v40, %v799_v55 }
 0x16f   : > { %1573 = shalt.err (!%p1570_p9)
}
 0x170   : > { %s1574_s5 = scalar_lea.hbm %s1997_s14, 2048  ;;  %s1578_s22 = scalar_lea.hbm %s2174_s2, 4096 }
 0x171   : > { %p1575_p1 = scmp.ne.s32.totalorder %s1997_s14, %s1574_s5  ;;  %p1579_p7 = scmp.lt.u32.totalorder %s1997_s14, %s2174_s2 }
 0x172   : > { %p1580_p13 = scmp.lt.u32.totalorder %s1578_s22, %s1574_s5  ;;  %p1582_p6 = scmp.lt.u32.totalorder %s1574_s5, %s1997_s14 }
 0x173   : > { %p1576_p2 = pnand %p1575_p1, %p1839_p10 }
 0x174   : > { %p1581_p4 = por %p1580_p13, %p1579_p7 }
 0x175   : > { %p1577_p3 = pneg %p1576_p2 }
 0x176   : > { %p1583_p8 = por %p1582_p6, %p1581_p4 }
 0x178   : > { %p1584_p12 = pnand %p1583_p8, %p1577_p3 }
 0x17a   : > { %1587 = shalt.err (!%p1584_p12)
}
 0x17b   : > { %s1713_s13 = smov 64   ;;  %s1714_s27 = smov 4   ;;  %v801_v62 = vadd.f32 %v800_v60, %v1932_v27  ;;  %v870_v63 = vadd.f32 %v869_v59, %v839_v58  ;;  %v841_v2 = vmul.f32 %v1938_v34, %v1938_v34  ;;  %v842_v3 = vmul.f32 %v1930_v25, %v1930_v25 }
 0x17c   : > { %1397 = dma.vmem_to_hbm [thread:$0]  (%p1839_p10), %s1999_s25, 2048, %s1997_s14, %s895_s30, %s1713_s13, %s1713_s13, %s1714_s27   ;;  %v843_v7 = vmul.f32 %v1934_v29, %v1934_v29  ;;  %v844_v27 = vmul.f32 %v1952_v48, %v1952_v48  ;;  %v845_v15 = vmul.f32 %v1958_v57, %v1958_v57  ;;  %v849_v24 = vmul.f32 %v1974_v17, %v1974_v17 }
 0x17d   : > { %v871_v0 = vadd.f32 %v870_v63, %v840_v61  ;;  %v802_v1 = vadd.f32 %v801_v62, %v1938_v34  ;;  %v854_v38 = vmul.f32 %v1982_v33, %v1982_v33  ;;  %v855_v40 = vmul.f32 %v1988_v41, %v1988_v41  ;;  %s899_s25 = sand.u32 1, %s1773_s21   ;;  %s1170_s14 = sshll.u32 %s1698_s18, 4 }
 0x17e   : > { %s263_s30 = scalar_lea.vmem [#allocation8], %s1898_s10  ;;  %s269_s9 = scalar_lea.vmem [#allocation10], %s1898_s10 }
 0x17f   : > { %v803_v4 = vadd.f32 %v1930_v25, %v802_v1  ;;  %v872_v5 = vadd.f32 %v871_v0, %v841_v2  ;;  %v846_v25 = vmul.f32 %v1950_v46, %v1950_v46  ;;  %s936_s7 = sshll.u32 %s263_s30, 4  ;;  %s950_s11 = sshll.u32 %s269_s9, 4  ;;  %s2090_s7 = int_to_ptr.vmem [resolvable:$true] %s936_s7  ;;  %s2097_s11 = int_to_ptr.vmem [resolvable:$true] %s950_s11 }
 0x180   : > { %s2088_s6 = scalar_lea.hbm %s2175_s3, %s1170_s14  ;;  %s2095_s22 = scalar_lea.hbm %s2176_s4, %s1170_s14 }
 0x181   : > { %v873_v9 = vadd.f32 %v872_v5, %v842_v3  ;;  %v804_v10 = vadd.f32 %v1934_v29, %v803_v4  ;;  %v847_v29 = vmul.f32 %v1954_v53, %v1954_v53  ;;  %s2099_s23 = scalar_lea.sflag [#allocation9], %s899_s25  ;;  %s1588_s12 = scalar_lea.vmem %s2090_s7, 16 }
 0x182   : > { %p1589_p11 = scmp.ne.s32.totalorder %s2090_s7, %s1588_s12  ;;  %s1715_s13 = smov [#allocation8]  }
 0x183   : > { %v805_v11 = vadd.f32 %v804_v10, %v1952_v48  ;;  %v874_v12 = vadd.f32 %v873_v9, %v843_v7  ;;  %v848_v48 = vmul.f32 %v1968_v8, %v1968_v8  ;;  %s1592_s27 = sshll.u32 %s1715_s13, 4  ;;  %s1593_s27 = int_to_ptr.vmem [resolvable:$false] %s1592_s27 }
 0x184   : > { %p1590_p0 = pnand %p1589_p11, %p1839_p10  ;;  %s1594_s5 = scalar_lea.vmem %s1593_s27, 32 }
 0x185   : > { %v875_v14 = vadd.f32 %v874_v12, %v844_v27  ;;  %v806_v34 = vadd.f32 %v805_v11, %v1958_v57  ;;  %p1595_p9 = scmp.lt.s32.totalorder %s2090_s7, %s1593_s27  ;;  %p1596_p1 = scmp.lt.s32.totalorder %s1594_s5, %s1588_s12 }
 0x186   : > { %p1591_p5 = pneg %p1590_p0 }
 0x187   : > { %v807_v16 = vadd.f32 %v1950_v46, %v806_v34  ;;  %v876_v18 = vadd.f32 %v875_v14, %v845_v15  ;;  %v850_v46 = vmul.f32 %v1966_v6, %v1966_v6  ;;  %p1597_p2 = por %p1596_p1, %p1595_p9 }
 0x189   : > { %v877_v19 = vadd.f32 %v876_v18, %v846_v25  ;;  %v808_v20 = vadd.f32 %v1954_v53, %v807_v16  ;;  %v851_v53 = vmul.f32 %v1970_v13, %v1970_v13  ;;  %p1598_p3 = pnand %p1597_p2, %p1591_p5 }
 0x18b   : > { %v809_v21 = vadd.f32 %v808_v20, %v1968_v8  ;;  %v878_v22 = vadd.f32 %v877_v19, %v847_v29  ;;  %v852_v8 = vmul.f32 %v1984_v36, %v1984_v36 }
 0x18d   : > { %v879_v23 = vadd.f32 %v878_v22, %v848_v48  ;;  %v810_v57 = vadd.f32 %v809_v21, %v1974_v17 }
 0x18f   : > { %v811_v26 = vadd.f32 %v1966_v6, %v810_v57  ;;  %v880_v28 = vadd.f32 %v879_v23, %v849_v24  ;;  %v853_v6 = vmul.f32 %v1992_v45, %v1992_v45 }
 0x191   : > { %v881_v30 = vadd.f32 %v880_v28, %v850_v46  ;;  %v812_v31 = vadd.f32 %v1970_v13, %v811_v26 }
 0x193   : > { %v813_v32 = vadd.f32 %v812_v31, %v1984_v36  ;;  %v882_v35 = vadd.f32 %v881_v30, %v851_v53 }
 0x195   : > { %v883_v37 = vadd.f32 %v882_v35, %v852_v8  ;;  %v814_v17 = vadd.f32 %v813_v32, %v1992_v45 }
 0x197   : > { %v815_v13 = vadd.f32 %v1982_v33, %v814_v17  ;;  %v884_v39 = vadd.f32 %v883_v37, %v853_v6 }
 0x199   : > { %v816_v36 = vadd.f32 %v1988_v41, %v815_v13  ;;  %v885_v42 = vadd.f32 %v884_v39, %v854_v38 }
 0x19b   : > { %v817_v43 = vrot.slane %v816_v36, 4  ;;  %v886_v44 = vadd.f32 %v885_v42, %v855_v40 }
 0x19d   : > { %v818_v47 = vadd.f32 %v817_v43, %v816_v36  ;;  %v887_v45 = vrot.slane %v886_v44, 4 }
 0x19f   : > { %v819_v49 = vrot.slane %v818_v47, 2  ;;  %v888_v50 = vadd.f32 %v887_v45, %v886_v44 }
 0x1a1   : > { %v820_v51 = vadd.f32 %v819_v49, %v818_v47  ;;  %v889_v52 = vrot.slane %v888_v50, 2 }
 0x1a3   : > { %v821_v33 = vrot.slane %v820_v51, 1  ;;  %v890_v54 = vadd.f32 %v889_v52, %v888_v50 }
 0x1a5   : > { %v891_v41 = vrot.slane %v890_v54, 1  ;;  %v822_v55 = vadd.f32 %v821_v33, %v820_v51 }
 0x1a7   : > { %823 = vst [vmem:[%s263_s30] sm:$0x1] %v822_v55  ;;  %v892_v56 = vadd.f32 %v891_v41, %v890_v54 }
 0x1a8   : > { %1601 = shalt.err (!%p1598_p3)
}
 0x1a9   : > { %s1602_s25 = scalar_lea.hbm %s2088_s6, 16  ;;  %s1606_s26 = scalar_lea.hbm %s2175_s3, 32 }
 0x1aa   : > { %p1603_p7 = scmp.ne.s32.totalorder %s2088_s6, %s1602_s25  ;;  %p1607_p6 = scmp.lt.u32.totalorder %s2088_s6, %s2175_s3 }
 0x1ab   : > { %p1608_p8 = scmp.lt.u32.totalorder %s1606_s26, %s1602_s25  ;;  %p1610_p11 = scmp.lt.u32.totalorder %s1602_s25, %s2088_s6 }
 0x1ac   : > { %p1604_p13 = pnand %p1603_p7, %p1839_p10 }
 0x1ad   : > { %p1609_p12 = por %p1608_p8, %p1607_p6 }
 0x1ae   : > { %p1605_p4 = pneg %p1604_p13 }
 0x1af   : > { %p1611_p0 = por %p1610_p11, %p1609_p12 }
 0x1b1   : > { %p1612_p5 = pnand %p1611_p0, %p1605_p4 }
 0x1b3   : > { %1615 = shalt.err (!%p1612_p5)
}
 0x1b4   : > { %1398 = dma.vmem_to_hbm [thread:$0]  (%p1839_p10), %s2090_s7, 16, %s2088_s6, %s2099_s23   ;;  %893 = vst [vmem:[%s269_s9] sm:$0x1] %v892_v56 }
 0x1b5   : > { %s1616_s12 = scalar_lea.vmem %s2097_s11, 16  ;;  %s1716_s13 = smov [#allocation10]  }
 0x1b6   : > { %p1617_p9 = scmp.ne.s32.totalorder %s2097_s11, %s1616_s12  ;;  %s1620_s27 = sshll.u32 %s1716_s13, 4  ;;  %s1621_s27 = int_to_ptr.vmem [resolvable:$false] %s1620_s27 }
 0x1b7   : > { %s1622_s5 = scalar_lea.vmem %s1621_s27, 32  ;;  %p1623_p3 = scmp.lt.s32.totalorder %s2097_s11, %s1621_s27 }
 0x1b8   : > { %p1618_p1 = pnand %p1617_p9, %p1839_p10  ;;  %p1624_p7 = scmp.lt.s32.totalorder %s1622_s5, %s1616_s12 }
 0x1ba   : > { %p1619_p2 = pneg %p1618_p1  ;;  %p1625_p13 = por %p1624_p7, %p1623_p3 }
 0x1bc   : > { %p1626_p4 = pnand %p1625_p13, %p1619_p2 }
 0x1be   : > { %1629 = shalt.err (!%p1626_p4)
}
 0x1bf   : > { %s1630_s10 = scalar_lea.hbm %s2095_s22, 16  ;;  %s1634_s6 = scalar_lea.hbm %s2176_s4, 32 }
 0x1c0   : > { %p1631_p6 = scmp.ne.s32.totalorder %s2095_s22, %s1630_s10  ;;  %p1635_p11 = scmp.lt.u32.totalorder %s2095_s22, %s2176_s4 }
 0x1c1   : > { %p1636_p0 = scmp.lt.u32.totalorder %s1634_s6, %s1630_s10  ;;  %p1638_p9 = scmp.lt.u32.totalorder %s1630_s10, %s2095_s22 }
 0x1c2   : > { %p1632_p8 = pnand %p1631_p6, %p1839_p10 }
 0x1c3   : > { %p1637_p5 = por %p1636_p0, %p1635_p11 }
 0x1c4   : > { %p1633_p12 = pneg %p1632_p8 }
 0x1c5   : > { %p1639_p1 = por %p1638_p9, %p1637_p5 }
 0x1c7   : > { %p1640_p2 = pnand %p1639_p1, %p1633_p12 }
 0x1c9   : > { %1643 = shalt.err (!%p1640_p2)
}
 0x1ca   : > { %1399 = dma.vmem_to_hbm [thread:$0]  (%p1839_p10), %s2097_s11, 16, %s2095_s22, %s2099_s23  }
 0x1cb PF: > { %s962_s30 = sand.u32 1, %s1686_s15   ;;  %p2193_p3 = scmp.ne.s32.totalorder %s2182_s24, 0 }
 0x1cc   : > { %p2194_p7 = scmp.ge.s32.totalorder %s1706_s20, 2  ;;  %s963_s26 = scalar_lea.sflag [#allocation4], %s962_s30 }
 0x1ce   : > { %p1412_p13 = pnand %p2194_p7, %p2193_p3 }
 0x1d0   : > { %1677 = dma.done.wait (!%p1412_p13), %s963_s26, 2048  }
 0x1d1   : > { %1679 = vsyncadd (!%p1412_p13), %s963_s26, 4294965248  ;;  %s2195_s18 = sadd.s32 4294967294, %s1706_s20  }
 0x1d2   : > { %s971_s21 = sand.u32 1, %s2195_s18  }
 0x1d3   : > { %s972_s12 = scalar_lea.sflag [#allocation9], %s971_s21 }
 0x1d4   : > { %1681 = dma.done.wait (!%p1412_p13), %s972_s12, 32  }
 0x1d5   : > { %1683 = vsyncadd (!%p1412_p13), %s972_s12, 4294967264  ;;  %s25_s20 = sadd.s32 1, %s1706_s20   ;;  %s2196_s15 = smov %s1690_s16 }
 0x1d6   : > { %p22_p10 = scmp.ge.s32.totalorder %s25_s20, 4   ;;  %s2197_s16 = smov %s1694_s17 }
 0x1d7   : > { %s2198_s17 = smov %s1848_s8  ;;  %s2199_s18 = smov %s1702_s19 }
 0x1d8   : > { %s2200_s19 = smov %s2202_s29  ;;  %24 = sbr.rel (!%p22_p10) target bundleno = 9 (0x9), region = 109 }
 0x1df   :  { %984 = vsyncpa [#allocation3], 1 }
 0x1e0   :  { %986 = vsyncpa [#allocation3 + $0x1], 1 }
 0x1e1   :  { %987 = vsyncpa [#allocation6], 1 }
 0x1e2   :  { %988 = vsyncpa [#allocation4], 1 }
 0x1e3   :  { %990 = vsyncpa [#allocation4 + $0x1], 1 }
 0x1e4   :  { %991 = vsyncpa [#allocation9], 1 }
 0x1e5   :  { %993 = vsyncpa [#allocation9 + $0x1], 1 }

</bundles_post_ra>
